<compile_context>
chip_gen: v5e
topology: v5e:2x2
jax: 0.10.0
libtpu: 0.0.40
codegen_flags: <defaults>
</compile_context>

<pallas_src>
import jax
import jax.numpy as jnp
from jax.experimental import pallas as pl
from jax.experimental.pallas import tpu as pltpu

EMBED_DIM = 32
BN_EPS = 1e-5


# ------------------------------- Pallas kernel ------------------------------
def graphrec_kernel(x_ref, a1_ref, a2_ref, a3_ref, a4_ref,
                    c1_ref, c2_ref, c3_ref, c4_ref, out_ref):
    f32 = jnp.float32
    dt = x_ref.dtype
    # x_ref: (2D, tb) = [e_u ; e_v] transposed.  y_k = relu(A_k @ y_{k-1} + c_k)
    y = jnp.dot(a1_ref[...], x_ref[...], preferred_element_type=f32)
    y = jnp.maximum(y + c1_ref[...], 0.0).astype(dt)    # bn1/bn2 folded + relu
    y = jnp.dot(a2_ref[...], y, preferred_element_type=f32)
    y = jnp.maximum(y + c2_ref[...], 0.0).astype(dt)    # w_*r2 @ w_uv1, bn3 folded + relu
    y = jnp.dot(a3_ref[...], y, preferred_element_type=f32)
    y = jnp.maximum(y + c3_ref[...], 0.0).astype(dt)    # w_uv2, bn4 folded + relu
    s = jnp.dot(a4_ref[...], y, preferred_element_type=f32)
    out_ref[...] = s + c4_ref[...]                      # (1, tb) lane-dense store


# ------------------------------ parameter folding ---------------------------
def _bn_affine(gamma, beta, mean, var):
    scale = gamma / jnp.sqrt(var + BN_EPS)
    shift = beta - mean * scale
    return scale, shift


def _block_diag(a, b):
    za = jnp.zeros((a.shape[0], b.shape[1]), a.dtype)
    zb = jnp.zeros((b.shape[0], a.shape[1]), a.dtype)
    return jnp.concatenate(
        [jnp.concatenate([a, za], axis=1),
         jnp.concatenate([zb, b], axis=1)], axis=0)


def _fold_params(params, compute_dtype):
    """Fold BN into weights, fuse tower linears; return transposed mats + bias cols."""
    s1, t1 = _bn_affine(*params["bn1"])
    s2, t2 = _bn_affine(*params["bn2"])
    s3, t3 = _bn_affine(*params["bn3"])
    s4, t4 = _bn_affine(*params["bn4"])

    w_ur1, b_ur1 = params["w_ur1"]; w_ur2, b_ur2 = params["w_ur2"]
    w_vr1, b_vr1 = params["w_vr1"]; w_vr2, b_vr2 = params["w_vr2"]
    w_uv1, b_uv1 = params["w_uv1"]; w_uv2, b_uv2 = params["w_uv2"]
    w_uv3, b_uv3 = params["w_uv3"]

    # layer 1: blockdiag(w_ur1, w_vr1), bn1/bn2 folded, then ReLU
    m1 = _block_diag(w_ur1.T * s1, w_vr1.T * s2)                          # (2D, 2D)
    c1 = jnp.concatenate([b_ur1 * s1 + t1, b_vr1 * s2 + t2])              # (2D,)
    # layer 2: blockdiag(w_ur2, w_vr2) @ w_uv1 (no nonlinearity between in eval
    # mode), bn3 folded, then ReLU
    w_uv1t_s3 = w_uv1.T * s3                                              # (2D, D)
    m2 = _block_diag(w_ur2.T, w_vr2.T) @ w_uv1t_s3                        # (2D, D)
    c2 = jnp.concatenate([b_ur2, b_vr2]) @ w_uv1t_s3 + b_uv1 * s3 + t3    # (D,)
    # layer 3: w_uv2, bn4 folded, then ReLU
    m3 = w_uv2.T * s4                                                     # (D, 16)
    c3 = b_uv2 * s4 + t4                                                  # (16,)
    # layer 4: w_uv3
    m4 = w_uv3.T                                                          # (16, 1)
    c4 = b_uv3                                                            # (1,)

    # kernel is transposed (features, batch): y = A @ x + c
    mats = tuple(m.T.astype(compute_dtype) for m in (m1, m2, m3, m4))
    biases = tuple(c[:, None].astype(jnp.float32) for c in (c1, c2, c3, c4))
    return mats, biases


# ------------------------------- forward wrapper ----------------------------
def graphrec_forward(nodes_u, nodes_v, params, *, tile_b=None,
                     compute_dtype=jnp.bfloat16):
    eu = params["user_table"][nodes_u]                  # (B, D)
    ev = params["item_table"][nodes_v]                  # (B, D)
    B, D = eu.shape
    # transposed, lane = batch; streaming input in compute dtype (bf16 by default)
    x_t = jnp.concatenate([eu, ev], axis=1).T.astype(compute_dtype)   # (2D, B)

    if tile_b is None:
        # prefer >= 2 grid steps (DMA pipelining + v7x dual-TC sharding),
        # lane-dense multiples of 128
        for cand in (256, 512, 128):
            if B % cand == 0 and B // cand >= 2:
                tile_b = cand
                break
        else:
            tile_b = B
    assert B % tile_b == 0
    assert tile_b == B or tile_b % 128 == 0, "tile_b must be a multiple of 128"

    mats, biases = _fold_params(params, compute_dtype)

    full = lambda a: pl.BlockSpec(a.shape, lambda i: (0, 0))
    scores = pl.pallas_call(
        graphrec_kernel,
        out_shape=jax.ShapeDtypeStruct((1, B), jnp.float32),
        grid=(B // tile_b,),
        in_specs=([pl.BlockSpec((2 * D, tile_b), lambda i: (0, i))]
                  + [full(a) for a in mats]
                  + [full(c) for c in biases]),
        out_specs=pl.BlockSpec((1, tile_b), lambda i: (0, i)),
        compiler_params=pltpu.CompilerParams(
            dimension_semantics=("parallel",)),
    )(x_t, *mats, *biases)
    return scores[0]                                    # (B,)


# ----------------------------- reference (pure JAX) -------------------------
def graphrec_reference(nodes_u, nodes_v, params):
    def lin(x, wb):
        w, b = wb
        return x @ w.T + b

    def bn(x, p):
        g, be, m, v = p
        return (x - m) / jnp.sqrt(v + BN_EPS) * g + be

    eu = params["user_table"][nodes_u]
    ev = params["item_table"][nodes_v]
    xu = jax.nn.relu(bn(lin(eu, params["w_ur1"]), params["bn1"]))
    xu = lin(xu, params["w_ur2"])
    xv = jax.nn.relu(bn(lin(ev, params["w_vr1"]), params["bn2"]))
    xv = lin(xv, params["w_vr2"])
    x_uv = jnp.concatenate([xu, xv], axis=1)
    x = jax.nn.relu(bn(lin(x_uv, params["w_uv1"]), params["bn3"]))
    x = jax.nn.relu(bn(lin(x, params["w_uv2"]), params["bn4"]))
    return lin(x, params["w_uv3"]).squeeze(-1)


# ----------------------------- deterministic init ---------------------------
def init_params(key, embed_dim=EMBED_DIM, num_users=64, num_items=64):
    keys = jax.random.split(key, 13)
    k = iter(keys)

    def linear(kk, fan_in, fan_out):
        bound = 1.0 / jnp.sqrt(jnp.float32(fan_in))
        kw, kb = jax.random.split(kk)
        w = jax.random.uniform(kw, (fan_out, fan_in), jnp.float32, -bound, bound)
        b = jax.random.uniform(kb, (fan_out,), jnp.float32, -bound, bound)
        return (w, b)

    def bn_params(kk, f):
        # non-default ("post-training") stats so the BN folding is actually exercised
        kg, kb, km, kv = jax.random.split(kk, 4)
        gamma = jax.random.uniform(kg, (f,), jnp.float32, 0.5, 1.5)
        beta = 0.1 * jax.random.normal(kb, (f,), jnp.float32)
        mean = 0.1 * jax.random.normal(km, (f,), jnp.float32)
        var = jax.random.uniform(kv, (f,), jnp.float32, 0.5, 1.5)
        return (gamma, beta, mean, var)

    return {
        "user_table": jax.random.normal(next(k), (num_users, embed_dim), jnp.float32),
        "item_table": jax.random.normal(next(k), (num_items, embed_dim), jnp.float32),
        "w_ur1": linear(next(k), embed_dim, embed_dim),
        "w_ur2": linear(next(k), embed_dim, embed_dim),
        "w_vr1": linear(next(k), embed_dim, embed_dim),
        "w_vr2": linear(next(k), embed_dim, embed_dim),
        "w_uv1": linear(next(k), embed_dim * 2, embed_dim),
        "w_uv2": linear(next(k), embed_dim, 16),
        "w_uv3": linear(next(k), 16, 1),
        "bn1": bn_params(next(k), embed_dim),
        "bn2": bn_params(next(k), embed_dim),
        "bn3": bn_params(next(k), embed_dim),
        "bn4": bn_params(next(k), 16),
    }


if __name__ == "__main__":
    key = jax.random.PRNGKey(0)
    kp, ku, kv = jax.random.split(key, 3)
    params = init_params(kp)

    batch = 1024
    nodes_u = jax.random.randint(ku, (batch,), 0, params["user_table"].shape[0])
    nodes_v = jax.random.randint(kv, (batch,), 0, params["item_table"].shape[0])

    ref = graphrec_reference(nodes_u, nodes_v, params)

    # f32 path: tight check of the fused/folded algebra (grid of 8 steps)
    out_f32 = jax.block_until_ready(
        graphrec_forward(nodes_u, nodes_v, params, tile_b=128,
                         compute_dtype=jnp.float32))
    assert out_f32.shape == (batch,)
    assert jnp.allclose(out_f32, ref, atol=1e-3, rtol=1e-3)

    # bf16 path (default: MXU-native inputs, half the HBM bytes); looser tolerance
    out_bf16 = jax.block_until_ready(graphrec_forward(nodes_u, nodes_v, params))
    assert out_bf16.shape == (batch,)
    assert jnp.allclose(out_bf16, ref, atol=5e-2, rtol=5e-2)

    print("KERNEL_OK")
</pallas_src>

<mosaic_0001>
module attributes {stable_mosaic.version = 11 : i64} {
  func.func @graphrec_kernel(%arg0: i32, %arg1: memref<64x128xf32, #tpu.memory_space<vmem>>, %arg2: memref<64x64xf32, #tpu.memory_space<vmem>>, %arg3: memref<32x64xf32, #tpu.memory_space<vmem>>, %arg4: memref<16x32xf32, #tpu.memory_space<vmem>>, %arg5: memref<1x16xf32, #tpu.memory_space<vmem>>, %arg6: memref<64x1xf32, #tpu.memory_space<vmem>>, %arg7: memref<32x1xf32, #tpu.memory_space<vmem>>, %arg8: memref<16x1xf32, #tpu.memory_space<vmem>>, %arg9: memref<1x1xf32, #tpu.memory_space<vmem>>, %arg10: memref<1x128xf32, #tpu.memory_space<vmem>>) attributes {dimension_semantics = [#tpu.dimension_semantics<parallel>], iteration_bounds = array<i64: 8>, scalar_prefetch = 0 : i64, scratch_operands = 0 : i64, tpu.core_type = #tpu.core_type<tc>, window_params = [{transform_indices = @transform_0, window_bounds = array<i64: 64, 128>}, {pipeline_mode = #tpu.pipeline_mode<synchronous>, transform_indices = @transform_1, window_bounds = array<i64: 64, 64>}, {pipeline_mode = #tpu.pipeline_mode<synchronous>, transform_indices = @transform_2, window_bounds = array<i64: 32, 64>}, {pipeline_mode = #tpu.pipeline_mode<synchronous>, transform_indices = @transform_3, window_bounds = array<i64: 16, 32>}, {pipeline_mode = #tpu.pipeline_mode<synchronous>, transform_indices = @transform_4, window_bounds = array<i64: 1, 16>}, {pipeline_mode = #tpu.pipeline_mode<synchronous>, transform_indices = @transform_5, window_bounds = array<i64: 64, 1>}, {pipeline_mode = #tpu.pipeline_mode<synchronous>, transform_indices = @transform_6, window_bounds = array<i64: 32, 1>}, {pipeline_mode = #tpu.pipeline_mode<synchronous>, transform_indices = @transform_7, window_bounds = array<i64: 16, 1>}, {pipeline_mode = #tpu.pipeline_mode<synchronous>, transform_indices = @transform_8, window_bounds = array<i64: 1, 1>}, {transform_indices = @transform_9, window_bounds = array<i64: 1, 128>}]} {
    %c0 = arith.constant 0 : index
    %c0_0 = arith.constant 0 : index
    %0 = vector.load %arg2[%c0, %c0_0] : memref<64x64xf32, #tpu.memory_space<vmem>>, vector<64x64xf32>
    %c0_1 = arith.constant 0 : index
    %c0_2 = arith.constant 0 : index
    %1 = vector.load %arg1[%c0_1, %c0_2] : memref<64x128xf32, #tpu.memory_space<vmem>>, vector<64x128xf32>
    %cst = arith.constant dense<0.000000e+00> : vector<64x128xf32>
    %2 = tpu.matmul %0, %1, %cst {dimension_numbers = #tpu.dot_dimension_numbers<[1], [0], [0], [1], [0, 0, 1, 1], [], []>} : vector<64x64xf32>, vector<64x128xf32>, vector<64x128xf32> -> vector<64x128xf32>
    %c0_3 = arith.constant 0 : index
    %c0_4 = arith.constant 0 : index
    %3 = vector.load %arg6[%c0_3, %c0_4] : memref<64x1xf32, #tpu.memory_space<vmem>>, vector<64x1xf32>
    %4 = vector.broadcast %3 : vector<64x1xf32> to vector<64x128xf32>
    %5 = arith.addf %2, %4 : vector<64x128xf32>
    %cst_5 = arith.constant 0.000000e+00 : f32
    %6 = vector.broadcast %cst_5 : f32 to vector<64x128xf32>
    %7 = arith.maximumf %5, %6 : vector<64x128xf32>
    %c0_6 = arith.constant 0 : index
    %c0_7 = arith.constant 0 : index
    %8 = vector.load %arg3[%c0_6, %c0_7] : memref<32x64xf32, #tpu.memory_space<vmem>>, vector<32x64xf32>
    %cst_8 = arith.constant dense<0.000000e+00> : vector<32x128xf32>
    %9 = tpu.matmul %8, %7, %cst_8 {dimension_numbers = #tpu.dot_dimension_numbers<[1], [0], [0], [1], [0, 0, 1, 1], [], []>} : vector<32x64xf32>, vector<64x128xf32>, vector<32x128xf32> -> vector<32x128xf32>
    %c0_9 = arith.constant 0 : index
    %c0_10 = arith.constant 0 : index
    %10 = vector.load %arg7[%c0_9, %c0_10] : memref<32x1xf32, #tpu.memory_space<vmem>>, vector<32x1xf32>
    %11 = vector.broadcast %10 : vector<32x1xf32> to vector<32x128xf32>
    %12 = arith.addf %9, %11 : vector<32x128xf32>
    %cst_11 = arith.constant 0.000000e+00 : f32
    %13 = vector.broadcast %cst_11 : f32 to vector<32x128xf32>
    %14 = arith.maximumf %12, %13 : vector<32x128xf32>
    %c0_12 = arith.constant 0 : index
    %c0_13 = arith.constant 0 : index
    %15 = vector.load %arg4[%c0_12, %c0_13] : memref<16x32xf32, #tpu.memory_space<vmem>>, vector<16x32xf32>
    %cst_14 = arith.constant dense<0.000000e+00> : vector<16x128xf32>
    %16 = tpu.matmul %15, %14, %cst_14 {dimension_numbers = #tpu.dot_dimension_numbers<[1], [0], [0], [1], [0, 0, 1, 1], [], []>} : vector<16x32xf32>, vector<32x128xf32>, vector<16x128xf32> -> vector<16x128xf32>
    %c0_15 = arith.constant 0 : index
    %c0_16 = arith.constant 0 : index
    %17 = vector.load %arg8[%c0_15, %c0_16] : memref<16x1xf32, #tpu.memory_space<vmem>>, vector<16x1xf32>
    %18 = vector.broadcast %17 : vector<16x1xf32> to vector<16x128xf32>
    %19 = arith.addf %16, %18 : vector<16x128xf32>
    %cst_17 = arith.constant 0.000000e+00 : f32
    %20 = vector.broadcast %cst_17 : f32 to vector<16x128xf32>
    %21 = arith.maximumf %19, %20 : vector<16x128xf32>
    %c0_18 = arith.constant 0 : index
    %c0_19 = arith.constant 0 : index
    %22 = vector.load %arg5[%c0_18, %c0_19] : memref<1x16xf32, #tpu.memory_space<vmem>>, vector<1x16xf32>
    %cst_20 = arith.constant dense<0.000000e+00> : vector<1x128xf32>
    %23 = tpu.matmul %22, %21, %cst_20 {dimension_numbers = #tpu.dot_dimension_numbers<[1], [0], [0], [1], [0, 0, 1, 1], [], []>} : vector<1x16xf32>, vector<16x128xf32>, vector<1x128xf32> -> vector<1x128xf32>
    %c0_21 = arith.constant 0 : index
    %c0_22 = arith.constant 0 : index
    %24 = vector.load %arg9[%c0_21, %c0_22] : memref<1x1xf32, #tpu.memory_space<vmem>>, vector<1x1xf32>
    %25 = vector.broadcast %24 : vector<1x1xf32> to vector<1x128xf32>
    %26 = arith.addf %23, %25 : vector<1x128xf32>
    %c0_23 = arith.constant 0 : index
    %c0_24 = arith.constant 0 : index
    %27 = vector.load %arg10[%c0_23, %c0_24] : memref<1x128xf32, #tpu.memory_space<vmem>>, vector<1x128xf32>
    tpu.vector_store %arg10[%c0_23, %c0_24], %26 {strides = array<i32>} : memref<1x128xf32, #tpu.memory_space<vmem>>, vector<1x128xf32>,
    return
  }
  func.func @transform_0(%arg0: i32) -> (i32, i32) {
    %c0_i32 = arith.constant 0 : i32
    %c0_i32_0 = arith.constant 0 : i32
    return %c0_i32, %arg0 : i32, i32
  }
  func.func @transform_1(%arg0: i32) -> (i32, i32) {
    %c0_i32 = arith.constant 0 : i32
    %c0_i32_0 = arith.constant 0 : i32
    %c0_i32_1 = arith.constant 0 : i32
    return %c0_i32, %c0_i32_0 : i32, i32
  }
  func.func @transform_2(%arg0: i32) -> (i32, i32) {
    %c0_i32 = arith.constant 0 : i32
    %c0_i32_0 = arith.constant 0 : i32
    %c0_i32_1 = arith.constant 0 : i32
    return %c0_i32, %c0_i32_0 : i32, i32
  }
  func.func @transform_3(%arg0: i32) -> (i32, i32) {
    %c0_i32 = arith.constant 0 : i32
    %c0_i32_0 = arith.constant 0 : i32
    %c0_i32_1 = arith.constant 0 : i32
    return %c0_i32, %c0_i32_0 : i32, i32
  }
  func.func @transform_4(%arg0: i32) -> (i32, i32) {
    %c0_i32 = arith.constant 0 : i32
    %c0_i32_0 = arith.constant 0 : i32
    %c0_i32_1 = arith.constant 0 : i32
    return %c0_i32, %c0_i32_0 : i32, i32
  }
  func.func @transform_5(%arg0: i32) -> (i32, i32) {
    %c0_i32 = arith.constant 0 : i32
    %c0_i32_0 = arith.constant 0 : i32
    %c0_i32_1 = arith.constant 0 : i32
    return %c0_i32, %c0_i32_0 : i32, i32
  }
  func.func @transform_6(%arg0: i32) -> (i32, i32) {
    %c0_i32 = arith.constant 0 : i32
    %c0_i32_0 = arith.constant 0 : i32
    %c0_i32_1 = arith.constant 0 : i32
    return %c0_i32, %c0_i32_0 : i32, i32
  }
  func.func @transform_7(%arg0: i32) -> (i32, i32) {
    %c0_i32 = arith.constant 0 : i32
    %c0_i32_0 = arith.constant 0 : i32
    %c0_i32_1 = arith.constant 0 : i32
    return %c0_i32, %c0_i32_0 : i32, i32
  }
  func.func @transform_8(%arg0: i32) -> (i32, i32) {
    %c0_i32 = arith.constant 0 : i32
    %c0_i32_0 = arith.constant 0 : i32
    %c0_i32_1 = arith.constant 0 : i32
    return %c0_i32, %c0_i32_0 : i32, i32
  }
  func.func @transform_9(%arg0: i32) -> (i32, i32) {
    %c0_i32 = arith.constant 0 : i32
    %c0_i32_0 = arith.constant 0 : i32
    return %c0_i32, %arg0 : i32, i32
  }
}

</mosaic_0001>

<bundles_post_ra>
// kernel: tpu_custom_call.1
= control target key start
LH: loop header
LB: loop body
LE: loop exit
PB: predicated region body
PF: predicated region fallthrough
CT: control target
= control target key end

     0   :  { %s1203_s0 = inlined_call_operand.hbm [shape: f32[64,1024], index: 0, kind: input, shape index: {}]   ;;  %s1204_s1 = inlined_call_operand.vmem [shape: f32[64,64], index: 1, kind: input, shape index: {}]   ;;  %s1205_s2 = inlined_call_operand.vmem [shape: f32[32,64], index: 2, kind: input, shape index: {}]   ;;  %s1206_s3 = inlined_call_operand.vmem [shape: f32[16,32], index: 3, kind: input, shape index: {}]   ;;  %s1207_s4 = inlined_call_operand.vmem [shape: f32[1,16], index: 4, kind: input, shape index: {}]   ;;  %s1208_s5 = inlined_call_operand.vmem [shape: f32[64,1], index: 5, kind: input, shape index: {}]   ;;  %s1209_s6 = inlined_call_operand.vmem [shape: f32[32,1], index: 6, kind: input, shape index: {}]   ;;  %s1210_s7 = inlined_call_operand.vmem [shape: f32[16,1], index: 7, kind: input, shape index: {}]   ;;  %s1211_s8 = inlined_call_operand.<no memory space> [shape: f32[1,1], index: 8, kind: input, shape index: {}]   ;;  %s1212_s9 = inlined_call_operand.hbm [shape: f32[1,1024], index: 9, kind: output, shape index: {}]  }
   0x1   :  { %v14_v0 = vstv %s1211_s8 }
   0x2   :  { %15 = vst [vmem:[#allocation2] sm:$0x1] %v14_v0 }
   0x3   :  { %16 = vsyncpa [#allocation4], 0 }
   0x4   :  { %18 = vsyncpa [#allocation4 + $0x1], 0 }
   0x5   :  { %19 = vsyncpa [#allocation5], 0 }
   0x6   :  { %21 = vsyncpa [#allocation5 + $0x1], 0  ;;  %s970_s11 = smov 0   ;;  %s972_s12 = smov 0  }
   0x7   :  { %s974_s13 = smov 0   ;;  %s976_s14 = smov 0  }
   0x8 LB: > { %1214 = sst [smem:[#allocation9_spill]] %s907_s13  ;;  %s991_s8 = sadd.s32 4294967295, %s911_s14   ;;  %s911_s14 = sphi %s976_s14, %s1225_s14   ;;  %s907_s13 = sphi %s974_s13, %s1222_s13   ;;  %s903_s12 = sphi %s972_s12, %s1224_s12   ;;  %s899_s11 = sphi %s970_s11, %s1223_s11  }
   0x9   : > { %s722_s15 = sadd.s32 4294967294, %s911_s14   ;;  %s995_s16 = sadd.s32 1, %s911_s14  }
   0xa   : > { %s34_s17 = sadd.s32 1, %s907_s13  ;;  %s31_s18 = ssub.s32 %s911_s14, %s995_s16 }
   0xb   : > { %p41_p0 = scmp.ne.s32.totalorder %s907_s13, %s903_s12  ;;  %p32_p1 = scmp.eq.s32.totalorder %s31_s18, 0 }
   0xc   : > { %p42_p2 = scmp.eq.s32.totalorder %s911_s14, 0  ;;  %p47_p3 = scmp.ne.s32.totalorder %s903_s12, %s899_s11 }
   0xd   : > { %p48_p4 = scmp.eq.s32.totalorder %s991_s8, 0  ;;  %p239_p7 = scmp.eq.s32.totalorder %s991_s8, 7 }
   0xe   : > { %s1007_s19 = scalar_select %p32_p1, %s907_s13, %s34_s17  }
   0xf   : > { %p1009_p5 = por %p42_p2, %p41_p0  ;;  %p1013_p6 = por %p48_p4, %p47_p3 }
  0x10   : > { %1215 = sst [smem:[#allocation10_spill]] %s1007_s19  ;;  %p245_p8 = scmp.eq.s32.totalorder %s722_s15, 7 }
  0x11   : > { %p774_p9 = scmp.lt.s32.totalorder %s911_s14, 8  ;;  %p1019_p10 = por %p239_p7, %p41_p0 }
  0x12   : > { %p1023_p11 = por %p245_p8, %p47_p3  ;;  %s289_s24 = sand.u32 1, %s907_s13  }
  0x13   : > { %s726_s25 = sshll.u32 %s911_s14, 3  ;;  %s725_s26 = sshll.u32 %s289_s24, 6 }
  0x14   : > { %s297_s29 = scalar_lea.hbm %s1203_s0, %s726_s25  ;;  %s293_s10 = scalar_lea.vmem [#allocation3], %s725_s26 }
  0x15   : > { %s298_s30 = sshll.u32 %s297_s29, 4  ;;  %s300_s17 = sshll.u32 %s293_s10, 4  ;;  %s299_s30 = int_to_ptr.hbm [resolvable:$true] %s298_s30  ;;  %s301_s17 = int_to_ptr.vmem [resolvable:$true] %s300_s17 }
  0x16   : > { %p1034_p12 = pnand %p774_p9, %p1009_p5  ;;  %p727_p13 = scmp.ge.s32.totalorder %s911_s14, 1 }
  0x17   : > { %s290_s18 = scalar_lea.sflag [#allocation4], %s289_s24  ;;  %s815_s19 = sshra.s32 %s299_s30, 4  ;;  %s816_s19 = int_to_ptr.hbm [resolvable:$true] %s815_s19 }
  0x18   : > { %s817_s13 = scalar_lea.hbm %s816_s19, 64  ;;  %p819_p1 = pneg %p1034_p12 }
  0x19   : > { %p818_p0 = scmp.ne.s32.totalorder %s816_s19, %s817_s13  ;;  %s822_s27 = scalar_lea.hbm %s1203_s0, 512 }
  0x1a   : > { %p823_p4 = scmp.lt.s32.totalorder %s816_s19, %s1203_s0  ;;  %p824_p5 = scmp.lt.s32.totalorder %s822_s27, %s817_s13 }
  0x1b   : > { %p820_p2 = pnand %p819_p1, %p818_p0 }
  0x1c   : > { %p825_p7 = por %p824_p5, %p823_p4 }
  0x1d   : > { %p821_p3 = pneg %p820_p2 }
  0x1f   : > { %p826_p8 = pnand %p825_p7, %p821_p3 }
  0x21   : > { %829 = shalt.err (!%p826_p8)
}
  0x22   : > { %s913_s24 = smov 1024   ;;  %s914_s29 = smov 128  }
  0x23   : > { %s915_s10 = smov 8   ;;  %p308_p9 = scmp.lt.s32.totalorder %s911_s14, 9 }
  0x24   : > { %769 = dma.hbm_to_vmem [thread:$0]  (!%p1034_p12), %s299_s30, 1024, %s301_s17, %s290_s18, %s913_s24, %s914_s29, %s915_s10  }
  0x25   : > { %p309_p0 = pnand %p727_p13, %p308_p9 }
  0x26   : > { %s1053_s25 = sand.u32 (!%p309_p0), 1, %s903_s12  }
  0x27   : > { %312 = sbr.rel (%p309_p0) target bundleno = 675 (0x2a3), region = 56  ;;  %s728_s13 = sshll.u32 (!%p309_p0), %s1053_s25, 6 }
  0x28   : > { %s315_s19 = scalar_lea.sflag (!%p309_p0), [#allocation4], %s1053_s25  ;;  %s1057_s26 = scalar_lea.vmem (!%p309_p0), [#allocation3], %s728_s13 }
  0x2c   : > { %890 = dma.done.wait (%p1013_p6), %s315_s19, 1024  }
  0x2d   : > { %892 = vsyncadd (%p1013_p6), %s315_s19, 4294966272  ;;  %v916_v1 = vmov 0   ;;  %v368_v2 = vld [vmem:[%s1057_s26 + $0x38] sm:$0xff]  ;;  %v367_v3 = vld [vmem:[%s1057_s26 + $0x30] sm:$0xff]  ;;  %vm417_vm0 = vcmask 523264   ;;  %vm578_vm1 = vcmask 261120   ;;  %s652_s18 = scalar_lea.hbm %s1212_s9, %s991_s8 }
  0x2e   : > { %812 = vset.pattern.permute.xlu0 %v916_v1  ;;  %813 = vset.pattern.permute.xlu1 %v916_v1  ;;  %v376_v4 = vld [vmem:[%s1208_s5 + $0x38] sm:$0xff]  ;;  %v366_v5 = vld [vmem:[%s1057_s26 + $0x28] sm:$0xff]  ;;  %v365_v7 = vld [vmem:[%s1057_s26 + $0x20] sm:$0xff]  ;;  %vm618_vm2 = vcmask 130048   ;;  %s352_s27 = scalar_lea.vmem [#allocation6], %s1053_s25  ;;  %s656_s28 = sshll.u32 %s652_s18, 4  ;;  %s657_s28 = int_to_ptr.hbm [resolvable:$true] %s656_s28 }
  0x2f   : > { %814 = vset.pattern.permute.xlu2 %v916_v1  ;;  %450 = vmatpush.msra.mxu0 %v368_v2  ;;  %v374_v6 = vld [vmem:[%s1208_s5 + $0x28] sm:$0xff]  ;;  %v364_v8 = vld [vmem:[%s1057_s26 + $0x18] sm:$0xff]  ;;  %v375_v9 = vld [vmem:[%s1208_s5 + $0x30] sm:$0xff]  ;;  %s654_s20 = sshll.u32 %s352_s27, 4  ;;  %s644_s24 = scalar_lea.sflag [#allocation5], %s1053_s25  ;;  %s655_s20 = int_to_ptr.vmem [resolvable:$true] %s654_s20 }
  0x30   : > { %747 = vmatpush.msra.mxu3 %v368_v2  ;;  %414 = vperm.xlu0 %812, %v376_v4   ;;  %v363_v10 = vld [vmem:[%s1057_s26 + $0x10] sm:$0xff]  ;;  %v373_v11 = vld [vmem:[%s1208_s5 + $0x20] sm:$0xff]  ;;  %v362_v12 = vld [vmem:[%s1057_s26 + $0x8] sm:$0xff]  ;;  %s859_s29 = sshra.s32 %s657_s28, 4  ;;  %s865_s19 = scalar_lea.hbm %s1212_s9, 8  ;;  %s860_s29 = int_to_ptr.hbm [resolvable:$true] %s859_s29 }
  0x31   : > { %746 = vmatpush.msra.mxu2 %v368_v2  ;;  %451 = vmatpush.msra.mxu0 %v367_v3  ;;  %v372_v13 = vld [vmem:[%s1208_s5 + $0x18] sm:$0xff]  ;;  %v361_v14 = vld [vmem:[%s1057_s26] sm:$0xff]  ;;  %v371_v20 = vld [vmem:[%s1208_s5 + $0x10] sm:$0xff]  ;;  %s861_s10 = scalar_lea.hbm %s860_s29, 1  ;;  %p866_p1 = scmp.lt.s32.totalorder %s860_s29, %s1212_s9 }
  0x32   : > { %749 = vmatpush.msra.mxu3 %v367_v3  ;;  %404 = vperm.xlu1 %813, %v374_v6   ;;  %v353_v15 = vld [vmem:[%s1204_s1] sm:$0xff]  ;;  %v358_v16 = vld [vmem:[%s1204_s1 + $0x28] sm:$0xff]  ;;  %v359_v22 = vld [vmem:[%s1204_s1 + $0x30] sm:$0xff]  ;;  %p862_p6 = scmp.ne.s32.totalorder %s860_s29, %s861_s10  ;;  %p867_p2 = scmp.lt.s32.totalorder %s865_s19, %s861_s10 }
  0x33   : > { %748 = vmatpush.msra.mxu2 %v367_v3  ;;  %452 = vmatpush.msra.mxu0 %v366_v5  ;;  %v370_v17 = vld [vmem:[%s1208_s5 + $0x8] sm:$0xff]  ;;  %v357_v18 = vld [vmem:[%s1204_s1 + $0x20] sm:$0xff]  ;;  %v497_v23 = vld [vmem:[%s1209_s6 + $0x10] sm:$0xff] }
  0x34   : > { %751 = vmatpush.msra.mxu3 %v366_v5  ;;  %394 = vperm.xlu2 %814, %v372_v13   ;;  %v369_v19 = vld [vmem:[%s1208_s5] sm:$0xff]  ;;  %v354_v21 = vld [vmem:[%s1204_s1 + $0x8] sm:$0xff]  ;;  %v498_v25 = vld [vmem:[%s1209_s6 + $0x18] sm:$0xff]  ;;  %p863_p12 = pnand %p862_p6, %p1019_p10  ;;  %p868_p3 = por %p867_p2, %p866_p1 }
  0x35   : > { %750 = vmatpush.msra.mxu2 %v366_v5  ;;  %453 = vmatpush.msra.mxu0 %v365_v7  ;;  %v496_v24 = vld [vmem:[%s1209_s6 + $0x8] sm:$0xff]  ;;  %v355_v26 = vld [vmem:[%s1204_s1 + $0x10] sm:$0xff]  ;;  %v360_v27 = vld [vmem:[%s1204_s1 + $0x38] sm:$0xff] }
  0x36   : > { %753 = vmatpush.msra.mxu3 %v365_v7  ;;  %v567_v28 = vld [vmem:[%s1210_s7 + $0x8] sm:$0xff]  ;;  %v566_v29 = vld [vmem:[%s1210_s7] sm:$0xff]  ;;  %v356_v31 = vld [vmem:[%s1204_s1 + $0x18] sm:$0xff]  ;;  %p864_p13 = pneg %p863_p12 }
  0x37   : > { %752 = vmatpush.msra.mxu2 %v365_v7  ;;  %454 = vmatpush.msra.mxu0 %v364_v8  ;;  %v495_v30 = vld [vmem:[%s1209_s6] sm:$0xff]  ;;  %v492_v2 = vld [vmem:[%s1205_s2 + $0x8] sm:$0xff]  ;;  %v493_v3 = vld [vmem:[%s1205_s2 + $0x10] sm:$0xff] }
  0x38   : > { %755 = vmatpush.msra.mxu3 %v364_v8  ;;  %409 = vperm.xlu0 %812, %v375_v9   ;;  %v611_v32 = vld [vmem:[#allocation2] sm:$0x1]  ;;  %v494_v4 = vld [vmem:[%s1205_s2 + $0x18] sm:$0xff]  ;;  %p869_p4 = pnand %p868_p3, %p864_p13 }
  0x39   : > { %754 = vmatpush.msra.mxu2 %v364_v8  ;;  %455 = vmatpush.msra.mxu0 %v363_v10  ;;  %v491_v1 = vld [vmem:[%s1205_s2] sm:$0xff] }
  0x3a   : > { %757 = vmatpush.msra.mxu3 %v363_v10  ;;  %399 = vperm.xlu1 %813, %v373_v11  }
  0x3b   : > { %756 = vmatpush.msra.mxu2 %v363_v10  ;;  %456 = vmatpush.msra.mxu0 %v362_v12 }
  0x3c   : > { %759 = vmatpush.msra.mxu3 %v362_v12  ;;  %389 = vperm.xlu2 %814, %v371_v20  }
  0x3d   : > { %758 = vmatpush.msra.mxu2 %v362_v12  ;;  %457 = vmatpush.msra.mxu0 %v361_v14 }
  0x3e   : > { %761 = vmatpush.msra.mxu3 %v361_v14  ;;  %729 = vmatmul.msk.f32.vlgmr.msra.gmra.mxu0 %vm417_vm0, %v353_v15 }
  0x3f   : > { %734 = vmatmul.msk.f32.vlgmr.msra.gmra.mxu3 %vm417_vm0, %v358_v16  ;;  %760 = vmatpush.msra.mxu2 %v361_v14 }
  0x40   : > { %384 = vperm.xlu0 %812, %v370_v17   ;;  %733 = vmatmul.msk.f32.vlgmr.msra.gmra.mxu2 %vm417_vm0, %v357_v18 }
  0x42   : > { %379 = vperm.xlu1 %813, %v369_v19  }
  0x44   : > { %516 = vperm.xlu2 %814, %v498_v25  }
  0x46   : > { %730 = vmatmul.msk.f32.gmra.mxu0 %vm417_vm0, %v354_v21  ;;  %v564_v21 = vld [vmem:[%s1206_s3] sm:$0xff] }
  0x47   : > { %735 = vmatmul.msk.f32.gmra.mxu3 %vm417_vm0, %v359_v22  ;;  %v565_v22 = vld [vmem:[%s1206_s3 + $0x8] sm:$0xff] }
  0x48   : > { %511 = vperm.xlu0 %812, %v497_v23  }
  0x4a   : > { %506 = vperm.xlu1 %813, %v496_v24  }
  0x4c   : > { %501 = vperm.xlu2 %814, %v495_v30  }
  0x4e   : > { %731 = vmatmul.msk.f32.gmra.mxu0 %vm417_vm0, %v355_v26 }
  0x4f   : > { %736 = vmatmul.msk.f32.gmra.mxu3 %vm417_vm0, %v360_v27 }
  0x50   : > { %575 = vperm.xlu0 %812, %v567_v28  }
  0x52   : > { %570 = vperm.xlu1 %813, %v566_v29  }
  0x54   : > { %614 = vperm.xlu2 %814, %v611_v32  }
  0x56   : > { %732 = vmatmul.msk.f32.gmra.mxu0 %vm417_vm0, %v356_v31  ;;  %v610_v31 = vld [vmem:[%s1207_s4] sm:$0x1] }
  0x8e   : > { %v395_v40 = vpop.permute.xlu2 %394 }
  0x96   : > { %v390_v54 = vpop.permute.xlu2 %389 }
  0x9e   : > { %v517_v8 = vpop.permute.xlu2 %516 }
  0xa2   : > { %v415_v36 = vpop.permute.xlu0 %414 }
  0xa4   : > { %v405_v37 = vpop.permute.xlu1 %404 }
  0xa6   : > { %v502_v16 = vpop.permute.xlu2 %501 }
  0xaa   : > { %v410_v41 = vpop.permute.xlu0 %409 }
  0xac   : > { %v400_v45 = vpop.permute.xlu1 %399 }
  0xae   : > { %v615_v32 = vpop.permute.xlu2 %614 }
  0xb2   : > { %v385_v57 = vpop.permute.xlu0 %384 }
  0xb4   : > { %v380_v60 = vpop.permute.xlu1 %379 }
  0xba   : > { %v512_v9 = vpop.permute.xlu0 %511 }
  0xbb   : > { %v459_v33 = vpop.f32.mrf.mxu0 }
  0xbc   : > { %v460_v61 = vadd.f32 %v459_v33, %v380_v60  ;;  %v507_v13 = vpop.permute.xlu1 %506  ;;  %v617_v33 = vperm.slane %v615_v32, 0 }
  0xbe   : > { %v483_v0 = vmax.f32 %v460_v61, 0.0 }
  0xc2   : > { %v474_v34 = vpop.f32.mrf.mxu3  ;;  %v576_v24 = vpop.permute.xlu0 %575 }
  0xc3   : > { %v462_v35 = vpop.f32.mrf.mxu0  ;;  %v471_v46 = vpop.f32.mrf.mxu2  ;;  %v475_v47 = vadd.f32 %v474_v34, %v405_v37 }
  0xc4   : > { %v472_v51 = vadd.f32 %v471_v46, %v400_v45  ;;  %v463_v58 = vadd.f32 %v462_v35, %v385_v57  ;;  %v571_v25 = vpop.permute.xlu1 %570 }
  0xc5   : > { %v488_v52 = vmax.f32 %v475_v47, 0.0 }
  0xc6   : > { %v487_v56 = vmax.f32 %v472_v51, 0.0  ;;  %v484_v63 = vmax.f32 %v463_v58, 0.0 }
  0xca   : > { %v477_v38 = vpop.f32.mrf.mxu3 }
  0xcb   : > { %v465_v39 = vpop.f32.mrf.mxu0  ;;  %v478_v43 = vadd.f32 %v477_v38, %v410_v41 }
  0xcc   : > { %v466_v55 = vadd.f32 %v465_v39, %v390_v54 }
  0xcd   : > { %v489_v50 = vmax.f32 %v478_v43, 0.0 }
  0xce   : > { %v485_v62 = vmax.f32 %v466_v55, 0.0 }
  0xd2   : > { %v480_v42 = vpop.f32.mrf.mxu3 }
  0xd3   : > { %v481_v44 = vadd.f32 %v480_v42, %v415_v36  ;;  %v468_v49 = vpop.f32.mrf.mxu0 }
  0xd4   : > { %v469_v53 = vadd.f32 %v468_v49, %v395_v40 }
  0xd5   : > { %v490_v48 = vmax.f32 %v481_v44, 0.0 }
  0xd6   : > { %v486_v59 = vmax.f32 %v469_v53, 0.0 }
  0xd7   : > { %539 = vmatpush.msra.mxu1 %v490_v48 }
  0xd9   : > { %540 = vmatpush.msra.mxu1 %v489_v50 }
  0xdb   : > { %541 = vmatpush.msra.mxu1 %v488_v52 }
  0xdd   : > { %542 = vmatpush.msra.mxu1 %v487_v56 }
  0xdf   : > { %543 = vmatpush.msra.mxu1 %v486_v59 }
  0xe1   : > { %544 = vmatpush.msra.mxu1 %v485_v62 }
  0xe3   : > { %545 = vmatpush.msra.mxu1 %v484_v63 }
  0xe5   : > { %546 = vmatpush.msra.mxu1 %v483_v0 }
  0xe6   : > { %737 = vmatmul.msk.f32.vlgmr.msra.gmra.mxu1 %vm417_vm0, %v491_v1 }
  0xee   : > { %738 = vmatmul.msk.f32.gmra.mxu1 %vm417_vm0, %v492_v2 }
  0xf6   : > { %739 = vmatmul.msk.f32.gmra.mxu1 %vm417_vm0, %v493_v3 }
  0xfe   : > { %740 = vmatmul.msk.f32.gmra.mxu1 %vm417_vm0, %v494_v4 }
 0x163   : > { %v548_v5 = vpop.f32.mrf.mxu1 }
 0x164   : > { %v549_v17 = vadd.f32 %v548_v5, %v502_v16 }
 0x166   : > { %v560_v20 = vmax.f32 %v549_v17, 0.0 }
 0x16b   : > { %v551_v6 = vpop.f32.mrf.mxu1 }
 0x16c   : > { %v552_v14 = vadd.f32 %v551_v6, %v507_v13 }
 0x16e   : > { %v561_v19 = vmax.f32 %v552_v14, 0.0 }
 0x173   : > { %v554_v7 = vpop.f32.mrf.mxu1 }
 0x174   : > { %v555_v11 = vadd.f32 %v554_v7, %v512_v9 }
 0x176   : > { %v562_v18 = vmax.f32 %v555_v11, 0.0 }
 0x17b   : > { %v557_v10 = vpop.f32.mrf.mxu1 }
 0x17c   : > { %v558_v12 = vadd.f32 %v557_v10, %v517_v8 }
 0x17e   : > { %v563_v15 = vmax.f32 %v558_v12, 0.0 }
 0x180   : > { %597 = vmatpush.msrb.mxu2 %v563_v15 }
 0x182   : > { %598 = vmatpush.msrb.mxu2 %v562_v18 }
 0x184   : > { %599 = vmatpush.msrb.mxu2 %v561_v19 }
 0x186   : > { %600 = vmatpush.msrb.mxu2 %v560_v20 }
 0x187   : > { %741 = vmatmul.msk.f32.vlgmr.msrb.gmra.mxu2 %vm578_vm1, %v564_v21 }
 0x18f   : > { %742 = vmatmul.msk.f32.gmra.mxu2 %vm578_vm1, %v565_v22 }
 0x20a   : > { %v602_v23 = vpop.f32.mrf.mxu2 }
 0x20b   : > { %v603_v27 = vadd.f32 %v602_v23, %v571_v25 }
 0x20d   : > { %v608_v30 = vmax.f32 %v603_v27, 0.0 }
 0x212   : > { %v605_v26 = vpop.f32.mrf.mxu2 }
 0x213   : > { %v606_v28 = vadd.f32 %v605_v26, %v576_v24 }
 0x215   : > { %v609_v29 = vmax.f32 %v606_v28, 0.0 }
 0x217   : > { %636 = vmatpush.msrb.mxu3 %v609_v29 }
 0x219   : > { %637 = vmatpush.msrb.mxu3 %v608_v30 }
 0x21a   : > { %743 = vmatmul.msk.f32.vlgmr.msrb.gmra.mxu3 %vm618_vm2, %v610_v31 }
 0x29d   : > { %v639_v34 = vpop.f32.mrf.mxu3 }
 0x29e   : > { %v640_v35 = vadd.f32 %v639_v34, %v617_v33 }
 0x2a0   : > { %642 = vst [vmem:[%s352_s27] sm:$0x1] %v640_v35 }
 0x2a1   : > { %872 = shalt.err (!%p869_p4)
}
 0x2a2   : > { %764 = dma.vmem_to_hbm [thread:$0]  (%p1019_p10), %s655_s20, 16, %s657_s28, %s644_s24  }
 0x2a3 PF: > { %p775_p5 = scmp.ge.s32.totalorder %s911_s14, 2  ;;  %s668_s25 = sand.u32 1, %s899_s11  }
 0x2a4   : > { %s669_s21 = scalar_lea.sflag [#allocation5], %s668_s25 }
 0x2a5   : > { %p771_p7 = pnand %p775_p5, %p1023_p11 }
 0x2a7   : > { %p772_p8 = pneg %p771_p7 }
 0x2a9   : > { %894 = dma.done.wait (%p772_p8), %s669_s21, 16  }
 0x2aa   : > { %896 = vsyncadd (%p772_p8), %s669_s21, 4294967280  ;;  %s1221_s26 = sld [smem:[#allocation9_spill]]  ;;  %p24_p9 = scmp.ge.s32.totalorder %s995_s16, 10  }
 0x2ab   : > { %s1222_s13 = sld [smem:[#allocation10_spill]]  ;;  %s1223_s11 = smov %s903_s12 }
 0x2ac   : > { %s1225_s14 = smov %s995_s16  ;;  %26 = sbr.rel (!%p24_p9) target bundleno = 8 (0x8), region = 101 }
 0x2b0   : > { %s1224_s12 = smov %s1221_s26 }
 0x2b1   :  { %674 = vsyncpa [#allocation4], 1 }
 0x2b2   :  { %676 = vsyncpa [#allocation4 + $0x1], 1 }
 0x2b3   :  { %677 = vsyncpa [#allocation5], 1 }
 0x2b4   :  { %679 = vsyncpa [#allocation5 + $0x1], 1 }

</bundles_post_ra>
